<compile_context>
chip_gen: v7x
topology: tpu7x:2x2x1
jax: 0.10.0
libtpu: 0.0.40
codegen_flags: <defaults>
</compile_context>

<pallas_src>
import jax
import jax.numpy as jnp
from jax import lax
from jax.experimental import pallas as pl
from jax.experimental.pallas import tpu as pltpu


def _bilinear_disc_kernel(b_sref, c_ref, hpl_ref, hmi_ref, wt_ref, out_ref):
    """One row tile of the bilinear discriminator.

    b_sref: (1,) f32 bias in SMEM.   c/hpl/hmi: (TM, C)   wt: (C, C) = W0^T
    out: (2, TM) lane-dense logit rows (row 0 = sc_1, row 1 = sc_2).
    """
    c = c_ref[...].astype(jnp.float32)
    # Shared projection: t[m, i] = sum_j W0[i, j] * c[m, j]  (single MXU pass per tile,
    # reused for both h_pl and h_mi).
    t = jnp.dot(c, wt_ref[...], preferred_element_type=jnp.float32)           # (TM, C)

    hp = hpl_ref[...].astype(jnp.float32)   # no-op when streaming f32
    hm = hmi_ref[...].astype(jnp.float32)

    # Row-wise dots h[m, :] . t[m, :], reduced via a ones-row matmul contracting the
    # channel (lane) axis so the (TM,) results land along LANES as (1, TM).
    ones_row = jnp.ones((1, c.shape[1]), jnp.float32)
    dn = (((1,), (1,)), ((), ()))                                             # contract last dims
    s1 = lax.dot_general(ones_row, hp * t, dn, preferred_element_type=jnp.float32)  # (1, TM)
    s2 = lax.dot_general(ones_row, hm * t, dn, preferred_element_type=jnp.float32)  # (1, TM)

    bias = b_sref[0]
    out_ref[...] = jnp.concatenate([s1, s2], axis=0) + bias                   # (2, TM)


def _round_up(x, m):
    return ((x + m - 1) // m) * m


def _vmem_budgets():
    """(per-tile working-set budget, vmem_limit_bytes), chosen per TPU generation."""
    try:
        kind = jax.devices()[0].device_kind.lower()
    except Exception:
        kind = ""
    if ("v4" in kind) or ("v5" in kind) or ("v6" in kind):
        # 128 MiB physical VMEM on these generations.
        return 64 * 1024 * 1024, 100 * 1024 * 1024
    # v7x (64 MiB physical, 2 TCs sharing HBM) or unknown: stay conservative per-core.
    return 20 * 1024 * 1024, 48 * 1024 * 1024


def _tile_vmem_bytes(tm, c, in_bytes):
    # 3 row-tiled inputs + one (2, tm) f32 output, each double-buffered, plus the
    # resident W0^T (Pallas still allocates 2 buffers for it) and layout slack.
    return (2 * (3 * tm * c * in_bytes + 2 * tm * 4)
            + 2 * c * c * 4
            + 8 * 128 * 4)


def _pick_row_tile(m, c, in_bytes, budget):
    """Largest lane-aligned row tile within the VMEM budget.

    If the whole problem fits in a single block, take it: grid steps cost ~0.35 us
    each and only v7x's 2 TensorCores ever profit from splitting (and only when
    per-core work dwarfs the per-step overhead)."""
    m_pad = max(_round_up(m, 128), 128)
    if _tile_vmem_bytes(m_pad, c, in_bytes) <= budget:
        return m_pad
    for tm in (32768, 16384, 8192, 4096, 2048, 1024, 512, 256, 128):
        if _tile_vmem_bytes(tm, c, in_bytes) <= budget:
            return tm
    return 128


def discriminator_forward(params, c, h_pl, h_mi, s_bias1=None, s_bias2=None,
                          stream_bf16=False):
    """JAX/Pallas equivalent of Discriminator.forward(c, h_pl, h_mi)."""
    B, N, C = c.shape
    M = B * N
    in_dtype = jnp.bfloat16 if stream_bf16 else jnp.float32
    c2 = c.reshape(M, C).astype(in_dtype)
    hpl2 = h_pl.reshape(M, C).astype(in_dtype)
    hmi2 = h_mi.reshape(M, C).astype(in_dtype)
    wt = jnp.transpose(params["weight"][0]).astype(jnp.float32)   # (C, C) = W0^T
    bias = params["bias"].reshape(1).astype(jnp.float32)

    budget, vmem_limit = _vmem_budgets()
    in_bytes = 2 if stream_bf16 else 4
    tm = _pick_row_tile(M, C, in_bytes, budget)
    grid = (pl.cdiv(M, tm),)   # ragged last block handled by Pallas (OOB writes dropped)

    flops = 2 * M * C * C + 2 * (2 * M * C)          # shared c@W^T + two ones-reductions
    bytes_accessed = 3 * M * C * in_bytes + (2 * M + C * C + 1) * 4

    out = pl.pallas_call(
        _bilinear_disc_kernel,
        out_shape=jax.ShapeDtypeStruct((2, M), jnp.float32),
        grid_spec=pltpu.PrefetchScalarGridSpec(
            num_scalar_prefetch=1,                           # bias -> SMEM
            grid=grid,
            in_specs=[
                pl.BlockSpec((tm, C), lambda i, b: (i, 0)),   # c
                pl.BlockSpec((tm, C), lambda i, b: (i, 0)),   # h_pl
                pl.BlockSpec((tm, C), lambda i, b: (i, 0)),   # h_mi
                pl.BlockSpec((C, C), lambda i, b: (0, 0)),    # W0^T (resident across tiles)
            ],
            out_specs=pl.BlockSpec((2, tm), lambda i, b: (0, i)),  # [sc_1; sc_2], lane-dense
        ),
        compiler_params=pltpu.CompilerParams(
            dimension_semantics=("parallel",),
            vmem_limit_bytes=vmem_limit,
        ),
        cost_estimate=pl.CostEstimate(flops=flops, transcendentals=0,
                                      bytes_accessed=bytes_accessed),
    )(bias, c2, hpl2, hmi2, wt)

    # torch.squeeze on (B, N, 1) -> (B, N); assumes B > 1 and N > 1 like the PyTorch code.
    # TODO(synk): torch.squeeze would also drop the batch dim when B == 1; not replicated here.
    sc_1 = out[0].reshape(B, N)
    sc_2 = out[1].reshape(B, N)
    if s_bias1 is not None:
        sc_1 = sc_1 + s_bias1
    if s_bias2 is not None:
        sc_2 = sc_2 + s_bias2
    logits = jnp.concatenate([sc_1, sc_2], axis=1)               # torch.cat((sc_1, sc_2), 1)
    return logits, logits[:, : logits.shape[1] // 2]


def init_params(key, n_h):
    """nn.Bilinear(n_h, n_h, 1) with xavier_uniform weight and zero bias (weights_init)."""
    limit = jnp.sqrt(6.0 / (n_h + n_h))
    w = jax.random.uniform(key, (1, n_h, n_h), jnp.float32, -limit, limit)
    return {"weight": w, "bias": jnp.zeros((1,), jnp.float32)}


def _reference(params, c, h_pl, h_mi):
    W0 = params["weight"][0]
    b = params["bias"][0]
    sc_1 = jnp.einsum("bni,ij,bnj->bn", h_pl, W0, c) + b
    sc_2 = jnp.einsum("bni,ij,bnj->bn", h_mi, W0, c) + b
    logits = jnp.concatenate([sc_1, sc_2], axis=1)
    return logits, logits[:, : logits.shape[1] // 2]


if __name__ == "__main__":
    B, N, n_h = 2, 256, 32

    key = jax.random.PRNGKey(0)
    kc, kpl, kmi, kw = jax.random.split(key, 4)
    c = jax.random.normal(kc, (B, N, n_h), jnp.float32)
    h_pl = jax.random.normal(kpl, (B, N, n_h), jnp.float32)
    h_mi = jax.random.normal(kmi, (B, N, n_h), jnp.float32)
    params = init_params(kw, n_h)

    fwd = jax.jit(discriminator_forward)
    logits, logits_half = jax.block_until_ready(fwd(params, c, h_pl, h_mi))

    assert logits.shape == (B, 2 * N)
    assert logits_half.shape == (B, N)

    ref_logits, ref_half = _reference(params, c, h_pl, h_mi)
    assert jnp.allclose(logits, ref_logits, atol=2e-4, rtol=2e-4)
    assert jnp.allclose(logits_half, ref_half, atol=2e-4, rtol=2e-4)

    print("KERNEL_OK")
</pallas_src>

<mosaic_0001>
module attributes {stable_mosaic.version = 11 : i64} {
  func.func @_bilinear_disc_kernel(%arg0: i32, %arg1: memref<1xf32, #tpu.memory_space<smem>>, %arg2: memref<512x32xf32, #tpu.memory_space<vmem>>, %arg3: memref<512x32xf32, #tpu.memory_space<vmem>>, %arg4: memref<512x32xf32, #tpu.memory_space<vmem>>, %arg5: memref<32x32xf32, #tpu.memory_space<vmem>>, %arg6: memref<2x512xf32, #tpu.memory_space<vmem>>) attributes {dimension_semantics = [#tpu.dimension_semantics<parallel>], iteration_bounds = array<i64: 1>, scalar_prefetch = 1 : i64, scratch_operands = 0 : i64, tpu.core_type = #tpu.core_type<tc>, window_params = [{transform_indices = @transform_0, window_bounds = array<i64: 512, 32>}, {transform_indices = @transform_1, window_bounds = array<i64: 512, 32>}, {transform_indices = @transform_2, window_bounds = array<i64: 512, 32>}, {pipeline_mode = #tpu.pipeline_mode<synchronous>, transform_indices = @transform_3, window_bounds = array<i64: 32, 32>}, {transform_indices = @transform_4, window_bounds = array<i64: 2, 512>}]} {
    %c0 = arith.constant 0 : index
    %c0_0 = arith.constant 0 : index
    %0 = vector.load %arg2[%c0, %c0_0] : memref<512x32xf32, #tpu.memory_space<vmem>>, vector<512x32xf32>
    %c0_1 = arith.constant 0 : index
    %c0_2 = arith.constant 0 : index
    %1 = vector.load %arg5[%c0_1, %c0_2] : memref<32x32xf32, #tpu.memory_space<vmem>>, vector<32x32xf32>
    %cst = arith.constant dense<0.000000e+00> : vector<512x32xf32>
    %2 = tpu.matmul %0, %1, %cst {dimension_numbers = #tpu.dot_dimension_numbers<[1], [0], [0], [1], [0, 0, 1, 1], [], []>} : vector<512x32xf32>, vector<32x32xf32>, vector<512x32xf32> -> vector<512x32xf32>
    %c0_3 = arith.constant 0 : index
    %c0_4 = arith.constant 0 : index
    %3 = vector.load %arg3[%c0_3, %c0_4] : memref<512x32xf32, #tpu.memory_space<vmem>>, vector<512x32xf32>
    %c0_5 = arith.constant 0 : index
    %c0_6 = arith.constant 0 : index
    %4 = vector.load %arg4[%c0_5, %c0_6] : memref<512x32xf32, #tpu.memory_space<vmem>>, vector<512x32xf32>
    %cst_7 = arith.constant 1.000000e+00 : f32
    %5 = vector.broadcast %cst_7 : f32 to vector<1x32xf32>
    %6 = arith.mulf %3, %2 : vector<512x32xf32>
    %cst_8 = arith.constant dense<0.000000e+00> : vector<1x512xf32>
    %7 = tpu.matmul %5, %6, %cst_8 {dimension_numbers = #tpu.dot_dimension_numbers<[1], [1], [0], [0], [0, 0, 1, 0], [], []>} : vector<1x32xf32>, vector<512x32xf32>, vector<1x512xf32> -> vector<1x512xf32>
    %8 = arith.mulf %4, %2 : vector<512x32xf32>
    %cst_9 = arith.constant dense<0.000000e+00> : vector<1x512xf32>
    %9 = tpu.matmul %5, %8, %cst_9 {dimension_numbers = #tpu.dot_dimension_numbers<[1], [1], [0], [0], [0, 0, 1, 0], [], []>} : vector<1x32xf32>, vector<512x32xf32>, vector<1x512xf32> -> vector<1x512xf32>
    %c0_10 = arith.constant 0 : index
    %10 = memref.load %arg1[%c0_10] : memref<1xf32, #tpu.memory_space<smem>>
    %11 = tpu.concatenate %7, %9 in 0 : vector<1x512xf32>, vector<1x512xf32> -> vector<2x512xf32>
    %12 = vector.broadcast %10 : f32 to vector<2x512xf32>
    %13 = arith.addf %11, %12 : vector<2x512xf32>
    %c0_11 = arith.constant 0 : index
    %c0_12 = arith.constant 0 : index
    %14 = vector.load %arg6[%c0_11, %c0_12] : memref<2x512xf32, #tpu.memory_space<vmem>>, vector<2x512xf32>
    tpu.vector_store %arg6[%c0_11, %c0_12], %13 {strides = array<i32>} : memref<2x512xf32, #tpu.memory_space<vmem>>, vector<2x512xf32>,
    return
  }
  func.func @transform_0(%arg0: i32, %arg1: memref<1xf32, #tpu.memory_space<smem>>) -> (i32, i32) {
    %c0_i32 = arith.constant 0 : i32
    %c0_i32_0 = arith.constant 0 : i32
    return %arg0, %c0_i32 : i32, i32
  }
  func.func @transform_1(%arg0: i32, %arg1: memref<1xf32, #tpu.memory_space<smem>>) -> (i32, i32) {
    %c0_i32 = arith.constant 0 : i32
    %c0_i32_0 = arith.constant 0 : i32
    return %arg0, %c0_i32 : i32, i32
  }
  func.func @transform_2(%arg0: i32, %arg1: memref<1xf32, #tpu.memory_space<smem>>) -> (i32, i32) {
    %c0_i32 = arith.constant 0 : i32
    %c0_i32_0 = arith.constant 0 : i32
    return %arg0, %c0_i32 : i32, i32
  }
  func.func @transform_3(%arg0: i32, %arg1: memref<1xf32, #tpu.memory_space<smem>>) -> (i32, i32) {
    %c0_i32 = arith.constant 0 : i32
    %c0_i32_0 = arith.constant 0 : i32
    %c0_i32_1 = arith.constant 0 : i32
    return %c0_i32, %c0_i32_0 : i32, i32
  }
  func.func @transform_4(%arg0: i32, %arg1: memref<1xf32, #tpu.memory_space<smem>>) -> (i32, i32) {
    %c0_i32 = arith.constant 0 : i32
    %c0_i32_0 = arith.constant 0 : i32
    return %c0_i32, %arg0 : i32, i32
  }
}

</mosaic_0001>

<bundles_post_ra>
// kernel: squeeze.4
= control target key start
LH: loop header
LB: loop body
LE: loop exit
PB: predicated region body
PF: predicated region fallthrough
CT: control target
= control target key end

     0   :  { %s41_s0 = inlined_call_operand.vmem [shape: f32[512], index: 0, kind: input, shape index: {}]   ;;  %s42_s1 = inlined_call_operand.vmem [shape: f32[2,256], index: 1, kind: output, shape index: {}]  }
   0x1   :  { %v4_v0 = vld [vmem:[%s41_s0] sm:$0xf] }
   0x2   :  { %5 = vst [vmem:[#allocation1] sm:$0xf] %v4_v0 }
   0x9   :  { %v6_v1 = vld [vmem:[#allocation1] sm:$0xf]  }
   0xa   :  { %7 = vst [vmem:[#allocation0] ss:$8 sm:$0x3] %v6_v1   ;;  %9 = vst [vmem:[#allocation0 - $0xf] ss:$8 sm:$0xc] %v6_v1  }
  0x11   :  { %v13_v2 = vld [vmem:[#allocation0] sm:$0x3]  ;;  %v17_v3 = vld [vmem:[#allocation0 + $0x8] sm:$0x3] }
  0x12   :  { %15 = vst [vmem:[%s42_s1] sm:$0x3] %v13_v2  ;;  %21 = vst [vmem:[%s42_s1 + $0x2] sm:$0x3] %v17_v3 }

// kernel: discriminator_forward.1
= control target key start
LH: loop header
LB: loop body
LE: loop exit
PB: predicated region body
PF: predicated region fallthrough
CT: control target
= control target key end

     0   :  { %vm87_vm0 = vcmask 261120   ;;  %vm1605_vm2 = vcmask 1040384   ;;  %s3567_s4 = inlined_call_operand.vmem [shape: f32[32,32], index: 4, kind: input, shape index: {}]   ;;  %s3568_s1 = inlined_call_operand.vmem [shape: f32[512,32], index: 1, kind: input, shape index: {}]   ;;  %s3569_s2 = inlined_call_operand.vmem [shape: f32[512,32], index: 2, kind: input, shape index: {}]   ;;  %s3570_s3 = inlined_call_operand.vmem [shape: f32[512,32], index: 3, kind: input, shape index: {}]   ;;  %s3571_s0 = inlined_call_operand.<no memory space> [shape: f32[1], index: 0, kind: input, shape index: {}]   ;;  %s3572_s5 = inlined_call_operand.vmem [shape: f32[2,512], index: 5, kind: output, shape index: {}]  }
   0x1   :  { %v83_v0 = vld [vmem:[%s3567_s4] sm:$0xff]  ;;  %v84_v1 = vld [vmem:[%s3567_s4 + $0x8] sm:$0xff]  ;;  %v85_v2 = vld [vmem:[%s3567_s4 + $0x10] sm:$0xff] }
   0x2   :  { %v2146_v3 = vpack.c.bf16 %v84_v1, %v83_v0  ;;  %v86_v4 = vld [vmem:[%s3567_s4 + $0x18] sm:$0xff]  ;;  %v19_v5 = vld [vmem:[%s3568_s1] sm:$0xff]  ;;  %v20_v7 = vld [vmem:[%s3568_s1 + $0x8] sm:$0xff] }
   0x3   :  { %v2150_v6 = vpack.c.bf16 %v86_v4, %v85_v2  ;;  %2050 = vmatprep.mubr.msk.f32.mxu0 %vm87_vm0, %v19_v5  ;;  %v21_v8 = vld [vmem:[%s3568_s1 + $0x10] sm:$0xff]  ;;  %v22_v9 = vld [vmem:[%s3568_s1 + $0x18] sm:$0xff]  ;;  %v23_v10 = vld [vmem:[%s3568_s1 + $0x20] sm:$0xff] }
   0x4   :  { %2147 = vmatprep.subr.bf16.mxu0 %v2146_v3  ;;  %v24_v11 = vld [vmem:[%s3568_s1 + $0x28] sm:$0xff]  ;;  %v25_v12 = vld [vmem:[%s3568_s1 + $0x30] sm:$0xff]  ;;  %v26_v13 = vld [vmem:[%s3568_s1 + $0x38] sm:$0xff] }
   0x5   :  { %2149 = vmatpush3.bf16.msra.mxu0 %v2146_v3  ;;  %v27_v14 = vld [vmem:[%s3568_s1 + $0x40] sm:$0xff]  ;;  %v28_v15 = vld [vmem:[%s3568_s1 + $0x48] sm:$0xff]  ;;  %v29_v16 = vld [vmem:[%s3568_s1 + $0x50] sm:$0xff] }
   0x6   :  { %2151 = vmatprep.subr.bf16.mxu0 %v2150_v6  ;;  %v30_v17 = vld [vmem:[%s3568_s1 + $0x58] sm:$0xff]  ;;  %v31_v18 = vld [vmem:[%s3568_s1 + $0x60] sm:$0xff]  ;;  %v32_v19 = vld [vmem:[%s3568_s1 + $0x68] sm:$0xff] }
   0x7   :  { %v33_v20 = vld [vmem:[%s3568_s1 + $0x70] sm:$0xff]  ;;  %v34_v21 = vld [vmem:[%s3568_s1 + $0x78] sm:$0xff]  ;;  %v35_v22 = vld [vmem:[%s3568_s1 + $0x80] sm:$0xff] }
   0x8   :  { %v36_v23 = vld [vmem:[%s3568_s1 + $0x88] sm:$0xff]  ;;  %v37_v24 = vld [vmem:[%s3568_s1 + $0x90] sm:$0xff]  ;;  %v38_v25 = vld [vmem:[%s3568_s1 + $0x98] sm:$0xff] }
   0x9   :  { %2153 = vmatpush3.bf16.msra.mxu0 %v2150_v6  ;;  %v39_v26 = vld [vmem:[%s3568_s1 + $0xa0] sm:$0xff]  ;;  %v40_v27 = vld [vmem:[%s3568_s1 + $0xa8] sm:$0xff]  ;;  %v41_v28 = vld [vmem:[%s3568_s1 + $0xb0] sm:$0xff]  ;;  %v3573_v6 = vmov 1.0  }
   0xa   :  { %v42_v29 = vld [vmem:[%s3568_s1 + $0xb8] sm:$0xff]  ;;  %v43_v30 = vld [vmem:[%s3568_s1 + $0xc0] sm:$0xff]  ;;  %v44_v31 = vld [vmem:[%s3568_s1 + $0xc8] sm:$0xff]  ;;  %1938 = vmatprep.mubr.msk.f32.mxu1 %vm87_vm0, %v3573_v6 }
   0xb   :  { %v45_v32 = vld [vmem:[%s3568_s1 + $0xd0] sm:$0xff]  ;;  %v46_v33 = vld [vmem:[%s3568_s1 + $0xd8] sm:$0xff]  ;;  %v47_v34 = vld [vmem:[%s3568_s1 + $0xe0] sm:$0xff] }
   0xc   :  { %2051 = vmatmul.mubr.msk.f32.vlgmr.msra.gmra.mrb[0].mxu0 %vm87_vm0, %v20_v7  ;;  %v48_v35 = vld [vmem:[%s3568_s1 + $0xe8] sm:$0xff]  ;;  %v49_v36 = vld [vmem:[%s3568_s1 + $0xf0] sm:$0xff]  ;;  %v50_v37 = vld [vmem:[%s3568_s1 + $0xf8] sm:$0xff] }
   0xd   :  { %2053 = vmatprep.mubr.msk.f32.mxu0 %vm87_vm0, %v21_v8  ;;  %v51_v38 = vld [vmem:[%s3568_s1 + $0x100] sm:$0xff]  ;;  %v52_v39 = vld [vmem:[%s3568_s1 + $0x108] sm:$0xff]  ;;  %v53_v40 = vld [vmem:[%s3568_s1 + $0x110] sm:$0xff] }
   0xe   :  { %v54_v41 = vld [vmem:[%s3568_s1 + $0x118] sm:$0xff]  ;;  %v55_v42 = vld [vmem:[%s3568_s1 + $0x120] sm:$0xff]  ;;  %v56_v43 = vld [vmem:[%s3568_s1 + $0x128] sm:$0xff] }
   0xf   :  { %v57_v44 = vld [vmem:[%s3568_s1 + $0x130] sm:$0xff]  ;;  %v58_v45 = vld [vmem:[%s3568_s1 + $0x138] sm:$0xff]  ;;  %v59_v46 = vld [vmem:[%s3568_s1 + $0x140] sm:$0xff] }
  0x10   :  { %2054 = vmatmul.mubr.msk.f32.gmra.mrb[2].mxu0 %vm87_vm0, %v22_v9  ;;  %v60_v47 = vld [vmem:[%s3568_s1 + $0x148] sm:$0xff]  ;;  %v61_v48 = vld [vmem:[%s3568_s1 + $0x150] sm:$0xff]  ;;  %v62_v49 = vld [vmem:[%s3568_s1 + $0x158] sm:$0xff] }
  0x11   :  { %2056 = vmatprep.mubr.msk.f32.mxu0 %vm87_vm0, %v23_v10  ;;  %v63_v50 = vld [vmem:[%s3568_s1 + $0x160] sm:$0xff]  ;;  %v64_v51 = vld [vmem:[%s3568_s1 + $0x168] sm:$0xff]  ;;  %v65_v52 = vld [vmem:[%s3568_s1 + $0x170] sm:$0xff] }
  0x12   :  { %v66_v53 = vld [vmem:[%s3568_s1 + $0x178] sm:$0xff]  ;;  %v67_v54 = vld [vmem:[%s3568_s1 + $0x180] sm:$0xff]  ;;  %v68_v55 = vld [vmem:[%s3568_s1 + $0x188] sm:$0xff] }
  0x13   :  { %v69_v56 = vld [vmem:[%s3568_s1 + $0x190] sm:$0xff]  ;;  %v70_v57 = vld [vmem:[%s3568_s1 + $0x198] sm:$0xff]  ;;  %v71_v58 = vld [vmem:[%s3568_s1 + $0x1a0] sm:$0xff] }
  0x14   :  { %2057 = vmatmul.mubr.msk.f32.gmra.mrb[4].mxu0 %vm87_vm0, %v24_v11  ;;  %v72_v59 = vld [vmem:[%s3568_s1 + $0x1a8] sm:$0xff]  ;;  %v73_v60 = vld [vmem:[%s3568_s1 + $0x1b0] sm:$0xff]  ;;  %v74_v61 = vld [vmem:[%s3568_s1 + $0x1b8] sm:$0xff] }
  0x15   :  { %2059 = vmatprep.mubr.msk.f32.mxu0 %vm87_vm0, %v25_v12  ;;  %v75_v62 = vld [vmem:[%s3568_s1 + $0x1c0] sm:$0xff]  ;;  %v76_v63 = vld [vmem:[%s3568_s1 + $0x1c8] sm:$0xff]  ;;  %v77_v0 = vld [vmem:[%s3568_s1 + $0x1d0] sm:$0xff] }
  0x16   :  { %v78_v1 = vld [vmem:[%s3568_s1 + $0x1d8] sm:$0xff]  ;;  %v79_v2 = vld [vmem:[%s3568_s1 + $0x1e0] sm:$0xff]  ;;  %v80_v3 = vld [vmem:[%s3568_s1 + $0x1e8] sm:$0xff] }
  0x17   :  { %v81_v4 = vld [vmem:[%s3568_s1 + $0x1f0] sm:$0xff]  ;;  %v82_v5 = vld [vmem:[%s3568_s1 + $0x1f8] sm:$0xff]  ;;  %v666_v7 = vld [vmem:[%s3569_s2 + $0x8] sm:$0xff] }
  0x18   :  { %2060 = vmatmul.mubr.msk.f32.gmra.mrb[6].mxu0 %vm87_vm0, %v26_v13  ;;  %v730_v8 = vld [vmem:[%s3570_s3 + $0x8] sm:$0xff]  ;;  %v665_v9 = vld [vmem:[%s3569_s2] sm:$0xff]  ;;  %vm2870_vm1 = vmpackc.low %vm87_vm0, %vm87_vm0 }
  0x19   :  { %2062 = vmatprep.mubr.msk.f32.mxu0 %vm87_vm0, %v27_v14  ;;  %v729_v10 = vld [vmem:[%s3570_s3] sm:$0xff] }
  0x1c   :  { %2063 = vmatmul.mubr.msk.f32.gmra.mrb[8].mxu0 %vm87_vm0, %v28_v15 }
  0x1d   :  { %2065 = vmatprep.mubr.msk.f32.mxu0 %vm87_vm0, %v29_v16 }
  0x20   :  { %2066 = vmatmul.mubr.msk.f32.gmra.mrb[10].mxu0 %vm87_vm0, %v30_v17  ;;  %v668_v17 = vld [vmem:[%s3569_s2 + $0x18] sm:$0xff] }
  0x21   :  { %2068 = vmatprep.mubr.msk.f32.mxu0 %vm87_vm0, %v31_v18  ;;  %v732_v18 = vld [vmem:[%s3570_s3 + $0x18] sm:$0xff] }
  0x24   :  { %2069 = vmatmul.mubr.msk.f32.gmra.mrb[12].mxu0 %vm87_vm0, %v32_v19  ;;  %v667_v19 = vld [vmem:[%s3569_s2 + $0x10] sm:$0xff] }
  0x25   :  { %2071 = vmatprep.mubr.msk.f32.mxu0 %vm87_vm0, %v33_v20  ;;  %v731_v20 = vld [vmem:[%s3570_s3 + $0x10] sm:$0xff] }
  0x28   :  { %2072 = vmatmul.mubr.msk.f32.gmra.mrb[14].mxu0 %vm87_vm0, %v34_v21 }
  0x29   :  { %2074 = vmatprep.mubr.msk.f32.mxu0 %vm87_vm0, %v35_v22 }
  0x2c   :  { %2075 = vmatmul.mubr.msk.f32.gmra.mrb[16].mxu0 %vm87_vm0, %v36_v23 }
  0x2d   :  { %2077 = vmatprep.mubr.msk.f32.mxu0 %vm87_vm0, %v37_v24 }
  0x30   :  { %2078 = vmatmul.mubr.msk.f32.gmra.mrb[18].mxu0 %vm87_vm0, %v38_v25 }
  0x31   :  { %2080 = vmatprep.mubr.msk.f32.mxu0 %vm87_vm0, %v39_v26 }
  0x34   :  { %2081 = vmatmul.mubr.msk.f32.gmra.mrb[20].mxu0 %vm87_vm0, %v40_v27 }
  0x35   :  { %2083 = vmatprep.mubr.msk.f32.mxu0 %vm87_vm0, %v41_v28 }
  0x38   :  { %2084 = vmatmul.mubr.msk.f32.gmra.mrb[22].mxu0 %vm87_vm0, %v42_v29  ;;  %v670_v29 = vld [vmem:[%s3569_s2 + $0x28] sm:$0xff] }
  0x39   :  { %2086 = vmatprep.mubr.msk.f32.mxu0 %vm87_vm0, %v43_v30  ;;  %v734_v30 = vld [vmem:[%s3570_s3 + $0x28] sm:$0xff] }
  0x3c   :  { %2087 = vmatmul.mubr.msk.f32.gmra.mrb[24].mxu0 %vm87_vm0, %v44_v31  ;;  %v669_v31 = vld [vmem:[%s3569_s2 + $0x20] sm:$0xff] }
  0x3d   :  { %2089 = vmatprep.mubr.msk.f32.mxu0 %vm87_vm0, %v45_v32  ;;  %v733_v32 = vld [vmem:[%s3570_s3 + $0x20] sm:$0xff] }
  0x40   :  { %2090 = vmatmul.mubr.msk.f32.gmra.mrb[26].mxu0 %vm87_vm0, %v46_v33 }
  0x41   :  { %2092 = vmatprep.mubr.msk.f32.mxu0 %vm87_vm0, %v47_v34 }
  0x44   :  { %2093 = vmatmul.mubr.msk.f32.gmra.mrb[28].mxu0 %vm87_vm0, %v48_v35 }
  0x45   :  { %2095 = vmatprep.mubr.msk.f32.mxu0 %vm87_vm0, %v49_v36 }
  0x48   :  { %2096 = vmatmul.mubr.msk.f32.gmra.mrb[30].mxu0 %vm87_vm0, %v50_v37 }
  0x49   :  { %2098 = vmatprep.mubr.msk.f32.mxu0 %vm87_vm0, %v51_v38 }
  0x4c   :  { %2099 = vmatmul.mubr.msk.f32.gmra.mrb[32].mxu0 %vm87_vm0, %v52_v39 }
  0x4d   :  { %2101 = vmatprep.mubr.msk.f32.mxu0 %vm87_vm0, %v53_v40 }
  0x50   :  { %2102 = vmatmul.mubr.msk.f32.gmra.mrb[34].mxu0 %vm87_vm0, %v54_v41  ;;  %v672_v41 = vld [vmem:[%s3569_s2 + $0x38] sm:$0xff] }
  0x51   :  { %2104 = vmatprep.mubr.msk.f32.mxu0 %vm87_vm0, %v55_v42  ;;  %v736_v42 = vld [vmem:[%s3570_s3 + $0x38] sm:$0xff] }
  0x54   :  { %2105 = vmatmul.mubr.msk.f32.gmra.mrb[36].mxu0 %vm87_vm0, %v56_v43  ;;  %v671_v43 = vld [vmem:[%s3569_s2 + $0x30] sm:$0xff] }
  0x55   :  { %2107 = vmatprep.mubr.msk.f32.mxu0 %vm87_vm0, %v57_v44  ;;  %v735_v44 = vld [vmem:[%s3570_s3 + $0x30] sm:$0xff] }
  0x58   :  { %2108 = vmatmul.mubr.msk.f32.gmra.mrb[38].mxu0 %vm87_vm0, %v58_v45 }
  0x59   :  { %2110 = vmatprep.mubr.msk.f32.mxu0 %vm87_vm0, %v59_v46 }
  0x5c   :  { %2111 = vmatmul.mubr.msk.f32.gmra.mrb[40].mxu0 %vm87_vm0, %v60_v47 }
  0x5d   :  { %2113 = vmatprep.mubr.msk.f32.mxu0 %vm87_vm0, %v61_v48 }
  0x60   :  { %2114 = vmatmul.mubr.msk.f32.gmra.mrb[42].mxu0 %vm87_vm0, %v62_v49 }
  0x61   :  { %2116 = vmatprep.mubr.msk.f32.mxu0 %vm87_vm0, %v63_v50 }
  0x64   :  { %2117 = vmatmul.mubr.msk.f32.gmra.mrb[44].mxu0 %vm87_vm0, %v64_v51 }
  0x65   :  { %2119 = vmatprep.mubr.msk.f32.mxu0 %vm87_vm0, %v65_v52 }
  0x68   :  { %2120 = vmatmul.mubr.msk.f32.gmra.mrb[46].mxu0 %vm87_vm0, %v66_v53  ;;  %v674_v53 = vld [vmem:[%s3569_s2 + $0x48] sm:$0xff] }
  0x69   :  { %2122 = vmatprep.mubr.msk.f32.mxu0 %vm87_vm0, %v67_v54  ;;  %v738_v54 = vld [vmem:[%s3570_s3 + $0x48] sm:$0xff] }
  0x6c   :  { %2123 = vmatmul.mubr.msk.f32.gmra.mrb[48].mxu0 %vm87_vm0, %v68_v55  ;;  %v673_v55 = vld [vmem:[%s3569_s2 + $0x40] sm:$0xff] }
  0x6d   :  { %2125 = vmatprep.mubr.msk.f32.mxu0 %vm87_vm0, %v69_v56  ;;  %v737_v56 = vld [vmem:[%s3570_s3 + $0x40] sm:$0xff] }
  0x70   :  { %2126 = vmatmul.mubr.msk.f32.gmra.mrb[50].mxu0 %vm87_vm0, %v70_v57 }
  0x71   :  { %2128 = vmatprep.mubr.msk.f32.mxu0 %vm87_vm0, %v71_v58 }
  0x74   :  { %2129 = vmatmul.mubr.msk.f32.gmra.mrb[52].mxu0 %vm87_vm0, %v72_v59 }
  0x75   :  { %2131 = vmatprep.mubr.msk.f32.mxu0 %vm87_vm0, %v73_v60 }
  0x78   :  { %2132 = vmatmul.mubr.msk.f32.gmra.mrb[54].mxu0 %vm87_vm0, %v74_v61 }
  0x79   :  { %2134 = vmatprep.mubr.msk.f32.mxu0 %vm87_vm0, %v75_v62 }
  0x7c   :  { %2135 = vmatmul.mubr.msk.f32.gmra.mrb[56].mxu0 %vm87_vm0, %v76_v63 }
  0x7d   :  { %2137 = vmatprep.mubr.msk.f32.mxu0 %vm87_vm0, %v77_v0 }
  0x80   :  { %2138 = vmatmul.mubr.msk.f32.gmra.mrb[58].mxu0 %vm87_vm0, %v78_v1  ;;  %v676_v1 = vld [vmem:[%s3569_s2 + $0x58] sm:$0xff] }
  0x81   :  { %2140 = vmatprep.mubr.msk.f32.mxu0 %vm87_vm0, %v79_v2  ;;  %v740_v2 = vld [vmem:[%s3570_s3 + $0x58] sm:$0xff] }
  0x84   :  { %2141 = vmatmul.mubr.msk.f32.gmra.mrb[60].mxu0 %vm87_vm0, %v80_v3  ;;  %v675_v3 = vld [vmem:[%s3569_s2 + $0x50] sm:$0xff] }
  0x85   :  { %2143 = vmatprep.mubr.msk.f32.mxu0 %vm87_vm0, %v81_v4  ;;  %v739_v4 = vld [vmem:[%s3570_s3 + $0x50] sm:$0xff] }
  0x88   :  { %2144 = vmatmul.mubr.msk.f32.gmra.mrb[62].mxu0 %vm87_vm0, %v82_v5 }
  0x89   :  { %2006 = vmatprep.mubr.msk.f32.mxu0 %vm87_vm0, %v3573_v6 }
  0xdf   :  { %v2052_v11 = vpop.f32.mrb[0].mxu0 }
  0xe0   :  { %v2664_v12 = vmul.f32 %v2052_v11, %v666_v7  ;;  %v2666_v13 = vmul.f32 %v2052_v11, %v730_v8  ;;  %v346_v14 = vpop.f32.mrb[1].mxu0 }
  0xe1   :  { %v2668_v15 = vmul.f32 %v665_v9, %v346_v14  ;;  %v2670_v16 = vmul.f32 %v729_v10, %v346_v14 }
  0xe3   :  { %v2157_v21 = vpack.c.bf16 %v2664_v12, %v2668_v15  ;;  %v2253_v22 = vpack.c.bf16 %v2666_v13, %v2670_v16  ;;  %v2055_v23 = vpop.f32.mrb[2].mxu0  ;;  %v688_v13 = vld [vmem:[%s3569_s2 + $0xb8] sm:$0xff]  ;;  %v687_v16 = vld [vmem:[%s3569_s2 + $0xb0] sm:$0xff] }
  0xe4   :  { %v2688_v24 = vmul.f32 %v2055_v23, %v668_v17  ;;  %v2690_v25 = vmul.f32 %v2055_v23, %v732_v18  ;;  %v356_v26 = vpop.f32.mrb[3].mxu0  ;;  %v678_v18 = vld [vmem:[%s3569_s2 + $0x68] sm:$0xff]  ;;  %v741_v23 = vld [vmem:[%s3570_s3 + $0x60] sm:$0xff] }
  0xe5   :  { %v2692_v27 = vmul.f32 %v667_v19, %v356_v26  ;;  %v2694_v28 = vmul.f32 %v731_v20, %v356_v26  ;;  %v742_v19 = vld [vmem:[%s3570_s3 + $0x68] sm:$0xff]  ;;  %v677_v20 = vld [vmem:[%s3569_s2 + $0x60] sm:$0xff] }
  0xe7   :  { %v2163_v33 = vpack.c.bf16 %v2688_v24, %v2692_v27  ;;  %v2259_v34 = vpack.c.bf16 %v2690_v25, %v2694_v28  ;;  %v2058_v35 = vpop.f32.mrb[4].mxu0 }
  0xe8   :  { %v2712_v36 = vmul.f32 %v2058_v35, %v670_v29  ;;  %v2714_v37 = vmul.f32 %v2058_v35, %v734_v30  ;;  %v366_v38 = vpop.f32.mrb[5].mxu0 }
  0xe9   :  { %v2716_v39 = vmul.f32 %v669_v31, %v366_v38  ;;  %v2718_v40 = vmul.f32 %v733_v32, %v366_v38 }
  0xeb   :  { %v2169_v45 = vpack.c.bf16 %v2712_v36, %v2716_v39  ;;  %v2265_v46 = vpack.c.bf16 %v2714_v37, %v2718_v40  ;;  %v2061_v47 = vpop.f32.mrb[6].mxu0 }
  0xec   :  { %v2736_v48 = vmul.f32 %v2061_v47, %v672_v41  ;;  %v2738_v49 = vmul.f32 %v2061_v47, %v736_v42  ;;  %v376_v50 = vpop.f32.mrb[7].mxu0  ;;  %v680_v42 = vld [vmem:[%s3569_s2 + $0x78] sm:$0xff]  ;;  %v743_v47 = vld [vmem:[%s3570_s3 + $0x70] sm:$0xff] }
  0xed   :  { %v2740_v51 = vmul.f32 %v671_v43, %v376_v50  ;;  %v2742_v52 = vmul.f32 %v735_v44, %v376_v50  ;;  %v744_v43 = vld [vmem:[%s3570_s3 + $0x78] sm:$0xff]  ;;  %v679_v44 = vld [vmem:[%s3569_s2 + $0x70] sm:$0xff] }
  0xef   :  { %v2175_v57 = vpack.c.bf16 %v2736_v48, %v2740_v51  ;;  %v2271_v58 = vpack.c.bf16 %v2738_v49, %v2742_v52  ;;  %v2064_v59 = vpop.f32.mrb[8].mxu0 }
  0xf0   :  { %v2760_v60 = vmul.f32 %v2064_v59, %v674_v53  ;;  %v2762_v61 = vmul.f32 %v2064_v59, %v738_v54  ;;  %v386_v62 = vpop.f32.mrb[9].mxu0 }
  0xf1   :  { %v2764_v63 = vmul.f32 %v673_v55, %v386_v62  ;;  %v2766_v0 = vmul.f32 %v737_v56, %v386_v62 }
  0xf3   :  { %v2181_v5 = vpack.c.bf16 %v2760_v60, %v2764_v63  ;;  %v2277_v7 = vpack.c.bf16 %v2762_v61, %v2766_v0  ;;  %v2067_v8 = vpop.f32.mrb[10].mxu0  ;;  %v786_v63 = vld [vmem:[%s3570_s3 + $0x1c8] sm:$0xff] }
  0xf4   :  { %v2784_v9 = vmul.f32 %v2067_v8, %v676_v1  ;;  %v2786_v10 = vmul.f32 %v2067_v8, %v740_v2  ;;  %v396_v11 = vpop.f32.mrb[11].mxu0  ;;  %v682_v2 = vld [vmem:[%s3569_s2 + $0x88] sm:$0xff]  ;;  %v745_v8 = vld [vmem:[%s3570_s3 + $0x80] sm:$0xff] }
  0xf5   :  { %v2788_v14 = vmul.f32 %v675_v3, %v396_v11  ;;  %v2790_v17 = vmul.f32 %v739_v4, %v396_v11  ;;  %v746_v3 = vld [vmem:[%s3570_s3 + $0x88] sm:$0xff]  ;;  %v681_v4 = vld [vmem:[%s3569_s2 + $0x80] sm:$0xff] }
  0xf6   :  { %v686_v11 = vld [vmem:[%s3569_s2 + $0xa8] sm:$0xff] }
  0xf7   :  { %v2187_v26 = vpack.c.bf16 %v2784_v9, %v2788_v14  ;;  %v2283_v29 = vpack.c.bf16 %v2786_v10, %v2790_v17  ;;  %v2070_v30 = vpop.f32.mrb[12].mxu0 }
  0xf8   :  { %v2808_v31 = vmul.f32 %v2070_v30, %v678_v18  ;;  %v2810_v32 = vmul.f32 %v2070_v30, %v742_v19  ;;  %v406_v35 = vpop.f32.mrb[13].mxu0 }
  0xf9   :  { %v2812_v38 = vmul.f32 %v677_v20, %v406_v35  ;;  %v2814_v41 = vmul.f32 %v741_v23, %v406_v35 }
  0xfb   :  { %v2193_v50 = vpack.c.bf16 %v2808_v31, %v2812_v38  ;;  %v2289_v53 = vpack.c.bf16 %v2810_v32, %v2814_v41  ;;  %v2073_v54 = vpop.f32.mrb[14].mxu0 }
  0xfc   :  { %v2832_v55 = vmul.f32 %v2073_v54, %v680_v42  ;;  %v2834_v56 = vmul.f32 %v2073_v54, %v744_v43  ;;  %v416_v59 = vpop.f32.mrb[15].mxu0  ;;  %v684_v43 = vld [vmem:[%s3569_s2 + $0x98] sm:$0xff]  ;;  %v747_v54 = vld [vmem:[%s3570_s3 + $0x90] sm:$0xff] }
  0xfd   :  { %v2836_v62 = vmul.f32 %v679_v44, %v416_v59  ;;  %v2838_v1 = vmul.f32 %v743_v47, %v416_v59  ;;  %v748_v44 = vld [vmem:[%s3570_s3 + $0x98] sm:$0xff]  ;;  %v683_v47 = vld [vmem:[%s3569_s2 + $0x90] sm:$0xff] }
  0xff   :  { %v2076_v19 = vpop.f32.mrb[16].mxu0 }
 0x100   :  { %v810_v20 = vmul.f32 %v2076_v19, %v682_v2  ;;  %v1211_v23 = vmul.f32 %v2076_v19, %v746_v3  ;;  %v426_v30 = vpop.f32.mrb[17].mxu0 }
 0x101   :  { %v809_v35 = vmul.f32 %v681_v4, %v426_v30  ;;  %v1210_v42 = vmul.f32 %v745_v8, %v426_v30 }
 0x103   :  { %v2250_v2 = vpack.c.bf16 %v1211_v23, %v1210_v42  ;;  %v2079_v3 = vpop.f32.mrb[18].mxu0  ;;  %v2154_v4 = vpack.c.bf16 %v810_v20, %v809_v35  ;;  %v750_v23 = vld [vmem:[%s3570_s3 + $0xa8] sm:$0xff]  ;;  %v685_v20 = vld [vmem:[%s3569_s2 + $0xa0] sm:$0xff] }
 0x104   :  { %v812_v8 = vmul.f32 %v2079_v3, %v684_v43  ;;  %v1213_v19 = vmul.f32 %v2079_v3, %v748_v44  ;;  %v436_v30 = vpop.f32.mrb[19].mxu0  ;;  %v749_v35 = vld [vmem:[%s3570_s3 + $0xa0] sm:$0xff] }
 0x105   :  { %v811_v6 = vmul.f32 %v683_v47, %v436_v30  ;;  %v1212_v18 = vmul.f32 %v747_v54, %v436_v30  ;;  %2156 = vmatprep.subr.msk.bf16.mxu1 %vm2870_vm1, %v2154_v4  ;;  %2252 = vmatprep.subr.msk.bf16.mxu0 %vm2870_vm1, %v2250_v2 }
 0x106   :  { %2159 = vmatpush3.bf16.xpose.msk.msra.mxu1 %vm2870_vm1, %v2157_v21  ;;  %2255 = vmatpush3.bf16.xpose.msk.msra.mxu0 %vm2870_vm1, %v2253_v22  ;;  %v751_v22 = vld [vmem:[%s3570_s3 + $0xb0] sm:$0xff] }
 0x107   :  { %v2160_v42 = vpack.c.bf16 %v812_v8, %v811_v6  ;;  %v2256_v43 = vpack.c.bf16 %v1213_v19, %v1212_v18  ;;  %v2082_v12 = vpop.f32.mrb[20].mxu0  ;;  %v752_v6 = vld [vmem:[%s3570_s3 + $0xb8] sm:$0xff] }
 0x108   :  { %v814_v15 = vmul.f32 %v2082_v12, %v686_v11  ;;  %v1215_v44 = vmul.f32 %v2082_v12, %v750_v23  ;;  %v446_v21 = vpop.f32.mrb[21].mxu0  ;;  %v690_v23 = vld [vmem:[%s3569_s2 + $0xc8] sm:$0xff] }
 0x109   :  { %v813_v47 = vmul.f32 %v685_v20, %v446_v21  ;;  %v1214_v54 = vmul.f32 %v749_v35, %v446_v21  ;;  %2162 = vmatprep.subr.msk.bf16.mxu1 %vm2870_vm1, %v2160_v42  ;;  %2258 = vmatprep.subr.msk.bf16.mxu0 %vm2870_vm1, %v2256_v43  ;;  %v754_v20 = vld [vmem:[%s3570_s3 + $0xc8] sm:$0xff]  ;;  %v689_v35 = vld [vmem:[%s3569_s2 + $0xc0] sm:$0xff]  ;;  %v691_v21 = vld [vmem:[%s3569_s2 + $0xd0] sm:$0xff] }
 0x10a   :  { %v753_v42 = vld [vmem:[%s3570_s3 + $0xc0] sm:$0xff] }
 0x10b   :  { %v2166_v11 = vpack.c.bf16 %v814_v15, %v813_v47  ;;  %v2262_v18 = vpack.c.bf16 %v1215_v44, %v1214_v54  ;;  %v2085_v2 = vpop.f32.mrb[22].mxu0  ;;  %v692_v15 = vld [vmem:[%s3569_s2 + $0xd8] sm:$0xff]  ;;  %v755_v47 = vld [vmem:[%s3570_s3 + $0xd0] sm:$0xff] }
 0x10c   :  { %v816_v3 = vmul.f32 %v2085_v2, %v688_v13  ;;  %v1217_v4 = vmul.f32 %v2085_v2, %v752_v6  ;;  %v456_v8 = vpop.f32.mrb[23].mxu0  ;;  %v756_v44 = vld [vmem:[%s3570_s3 + $0xd8] sm:$0xff] }
 0x10d   :  { %v815_v19 = vmul.f32 %v687_v16, %v456_v8  ;;  %v1216_v30 = vmul.f32 %v751_v22, %v456_v8  ;;  %v693_v8 = vld [vmem:[%s3569_s2 + $0xe0] sm:$0xff] }
 0x10e   :  { %2165 = vmatpush3.bf16.xpose.msk.msra.mxu1 %vm2870_vm1, %v2163_v33  ;;  %2261 = vmatpush3.bf16.xpose.msk.msra.mxu0 %vm2870_vm1, %v2259_v34 }
 0x10f   :  { %v2172_v43 = vpack.c.bf16 %v816_v3, %v815_v19  ;;  %v2268_v12 = vpack.c.bf16 %v1217_v4, %v1216_v30  ;;  %v2088_v24 = vpop.f32.mrb[24].mxu0  ;;  %2168 = vmatprep.subr.msk.bf16.mxu1 %vm2870_vm1, %v2166_v11  ;;  %2264 = vmatprep.subr.msk.bf16.mxu0 %vm2870_vm1, %v2262_v18  ;;  %v694_v3 = vld [vmem:[%s3569_s2 + $0xe8] sm:$0xff]  ;;  %v757_v19 = vld [vmem:[%s3570_s3 + $0xe0] sm:$0xff] }
 0x110   :  { %v818_v25 = vmul.f32 %v2088_v24, %v690_v23  ;;  %v1219_v27 = vmul.f32 %v2088_v24, %v754_v20  ;;  %v466_v28 = vpop.f32.mrb[25].mxu0  ;;  %v758_v4 = vld [vmem:[%s3570_s3 + $0xe8] sm:$0xff]  ;;  %v696_v20 = vld [vmem:[%s3569_s2 + $0xf8] sm:$0xff] }
 0x111   :  { %v817_v33 = vmul.f32 %v689_v35, %v466_v28  ;;  %v1218_v34 = vmul.f32 %v753_v42, %v466_v28  ;;  %v760_v35 = vld [vmem:[%s3570_s3 + $0xf8] sm:$0xff]  ;;  %v695_v42 = vld [vmem:[%s3569_s2 + $0xf0] sm:$0xff] }
 0x113   :  { %v2178_v54 = vpack.c.bf16 %v818_v25, %v817_v33  ;;  %v2274_v13 = vpack.c.bf16 %v1219_v27, %v1218_v34  ;;  %v2091_v6 = vpop.f32.mrb[26].mxu0 }
 0x114   :  { %v2954_v16 = vmul.f32 %v2091_v6, %v692_v15  ;;  %v2956_v22 = vmul.f32 %v2091_v6, %v756_v44  ;;  %v476_v11 = vpop.f32.mrb[27].mxu0  ;;  %v698_v44 = vld [vmem:[%s3569_s2 + $0x108] sm:$0xff]  ;;  %v761_v6 = vld [vmem:[%s3570_s3 + $0x100] sm:$0xff] }
 0x115   :  { %v2958_v18 = vmul.f32 %v691_v21, %v476_v11  ;;  %v2960_v2 = vmul.f32 %v755_v47, %v476_v11  ;;  %v762_v21 = vld [vmem:[%s3570_s3 + $0x108] sm:$0xff]  ;;  %v697_v47 = vld [vmem:[%s3569_s2 + $0x100] sm:$0xff]  ;;  %v700_v11 = vld [vmem:[%s3569_s2 + $0x118] sm:$0xff] }
 0x116   :  { %2171 = vmatpush3.bf16.xpose.msk.msra.mxu1 %vm2870_vm1, %v2169_v45  ;;  %2267 = vmatpush3.bf16.xpose.msk.msra.mxu0 %vm2870_vm1, %v2265_v46 }
 0x117   :  { %v2184_v36 = vpack.c.bf16 %v2954_v16, %v2958_v18  ;;  %v2280_v39 = vpack.c.bf16 %v2956_v22, %v2960_v2  ;;  %v2094_v45 = vpop.f32.mrb[28].mxu0  ;;  %2174 = vmatprep.subr.msk.bf16.mxu1 %vm2870_vm1, %v2172_v43  ;;  %2270 = vmatprep.subr.msk.bf16.mxu0 %vm2870_vm1, %v2268_v12  ;;  %v759_v43 = vld [vmem:[%s3570_s3 + $0xf0] sm:$0xff] }
 0x118   :  { %v2992_v37 = vmul.f32 %v2094_v45, %v694_v3  ;;  %v2994_v40 = vmul.f32 %v2094_v45, %v758_v4  ;;  %v486_v46 = vpop.f32.mrb[29].mxu0  ;;  %v763_v18 = vld [vmem:[%s3570_s3 + $0x110] sm:$0xff]  ;;  %v790_v3 = vld [vmem:[%s3570_s3 + $0x1e8] sm:$0xff] }
 0x119   :  { %v2996_v30 = vmul.f32 %v693_v8, %v486_v46  ;;  %v2998_v23 = vmul.f32 %v757_v19, %v486_v46 }
 0x11b   :  { %v2190_v12 = vpack.c.bf16 %v2992_v37, %v2996_v30  ;;  %v2286_v24 = vpack.c.bf16 %v2994_v40, %v2998_v23  ;;  %v2097_v25 = vpop.f32.mrb[30].mxu0  ;;  %v708_v37 = vld [vmem:[%s3569_s2 + $0x158] sm:$0xff]  ;;  %v707_v30 = vld [vmem:[%s3569_s2 + $0x150] sm:$0xff] }
 0x11c   :  { %v3016_v27 = vmul.f32 %v2097_v25, %v696_v20  ;;  %v3018_v28 = vmul.f32 %v2097_v25, %v760_v35  ;;  %v496_v33 = vpop.f32.mrb[31].mxu0  ;;  %v702_v35 = vld [vmem:[%s3569_s2 + $0x128] sm:$0xff]  ;;  %v765_v25 = vld [vmem:[%s3570_s3 + $0x120] sm:$0xff]  ;;  %v772_v40 = vld [vmem:[%s3570_s3 + $0x158] sm:$0xff] }
 0x11d   :  { %v3020_v34 = vmul.f32 %v695_v42, %v496_v33  ;;  %v3022_v15 = vmul.f32 %v759_v43, %v496_v33  ;;  %v766_v42 = vld [vmem:[%s3570_s3 + $0x128] sm:$0xff]  ;;  %v701_v43 = vld [vmem:[%s3569_s2 + $0x120] sm:$0xff]  ;;  %v771_v23 = vld [vmem:[%s3570_s3 + $0x150] sm:$0xff] }
 0x11e   :  { %2177 = vmatpush3.bf16.xpose.msk.msra.mxu1 %vm2870_vm1, %v2175_v57  ;;  %2273 = vmatpush3.bf16.xpose.msk.msra.mxu0 %vm2870_vm1, %v2271_v58 }
 0x11f   :  { %v2196_v48 = vpack.c.bf16 %v3016_v27, %v3020_v34  ;;  %v2292_v51 = vpack.c.bf16 %v3018_v28, %v3022_v15  ;;  %v2100_v57 = vpop.f32.mrb[32].mxu0  ;;  %2180 = vmatprep.subr.msk.bf16.mxu1 %vm2870_vm1, %v2178_v54  ;;  %2276 = vmatprep.subr.msk.bf16.mxu0 %vm2870_vm1, %v2274_v13  ;;  %v764_v54 = vld [vmem:[%s3570_s3 + $0x118] sm:$0xff]  ;;  %v699_v13 = vld [vmem:[%s3569_s2 + $0x110] sm:$0xff] }
 0x120   :  { %v3054_v49 = vmul.f32 %v2100_v57, %v698_v44  ;;  %v3056_v52 = vmul.f32 %v2100_v57, %v762_v21  ;;  %v506_v58 = vpop.f32.mrb[33].mxu0  ;;  %v704_v21 = vld [vmem:[%s3569_s2 + $0x138] sm:$0xff]  ;;  %v711_v34 = vld [vmem:[%s3569_s2 + $0x170] sm:$0xff]  ;;  %v722_v57 = vld [vmem:[%s3569_s2 + $0x1c8] sm:$0xff] }
 0x121   :  { %v3058_v16 = vmul.f32 %v697_v47, %v506_v58  ;;  %v3060_v22 = vmul.f32 %v761_v6, %v506_v58  ;;  %v767_v47 = vld [vmem:[%s3570_s3 + $0x130] sm:$0xff]  ;;  %v712_v27 = vld [vmem:[%s3569_s2 + $0x178] sm:$0xff] }
 0x122   :  { %v776_v28 = vld [vmem:[%s3570_s3 + $0x178] sm:$0xff]  ;;  %v775_v15 = vld [vmem:[%s3570_s3 + $0x170] sm:$0xff] }
 0x123   :  { %v2205_v2 = vpack.c.bf16 %v3054_v49, %v3058_v16  ;;  %v2103_v4 = vpop.f32.mrb[34].mxu0 }
 0x124   :  { %v3078_v8 = vmul.f32 %v2103_v4, %v700_v11  ;;  %v3080_v19 = vmul.f32 %v2103_v4, %v764_v54  ;;  %v516_v45 = vpop.f32.mrb[35].mxu0 }
 0x125   :  { %v3082_v46 = vmul.f32 %v699_v13, %v516_v45  ;;  %v3084_v20 = vmul.f32 %v763_v18, %v516_v45  ;;  %v706_v45 = vld [vmem:[%s3569_s2 + $0x148] sm:$0xff] }
 0x126   :  { %2183 = vmatpush3.bf16.xpose.msk.msra.mxu1 %vm2870_vm1, %v2181_v5  ;;  %2279 = vmatpush3.bf16.xpose.msk.msra.mxu0 %vm2870_vm1, %v2277_v7 }
 0x127   :  { %v2211_v60 = vpack.c.bf16 %v3078_v8, %v3082_v46  ;;  %v2106_v5 = vpop.f32.mrb[36].mxu0  ;;  %2186 = vmatprep.subr.msk.bf16.mxu1 %vm2870_vm1, %v2184_v36  ;;  %2282 = vmatprep.subr.msk.bf16.mxu0 %vm2870_vm1, %v2280_v39  ;;  %v768_v36 = vld [vmem:[%s3570_s3 + $0x138] sm:$0xff]  ;;  %v703_v39 = vld [vmem:[%s3569_s2 + $0x130] sm:$0xff] }
 0x128   :  { %v3116_v61 = vmul.f32 %v2106_v5, %v702_v35  ;;  %v3118_v0 = vmul.f32 %v2106_v5, %v766_v42  ;;  %v526_v7 = vpop.f32.mrb[37].mxu0  ;;  %v770_v35 = vld [vmem:[%s3570_s3 + $0x148] sm:$0xff]  ;;  %v705_v42 = vld [vmem:[%s3569_s2 + $0x140] sm:$0xff] }
 0x129   :  { %v3120_v33 = vmul.f32 %v701_v43, %v526_v7  ;;  %v3122_v44 = vmul.f32 %v765_v25, %v526_v7  ;;  %v769_v43 = vld [vmem:[%s3570_s3 + $0x140] sm:$0xff] }
 0x12b   :  { %v2217_v6 = vpack.c.bf16 %v3116_v61, %v3120_v33  ;;  %v2109_v58 = vpop.f32.mrb[38].mxu0 }
 0x12c   :  { %v3140_v11 = vmul.f32 %v2109_v58, %v704_v21  ;;  %v3142_v54 = vmul.f32 %v2109_v58, %v768_v36  ;;  %v536_v13 = vpop.f32.mrb[39].mxu0 }
 0x12d   :  { %v3144_v18 = vmul.f32 %v703_v39, %v536_v13  ;;  %v3146_v4 = vmul.f32 %v767_v47, %v536_v13  ;;  %v710_v13 = vld [vmem:[%s3569_s2 + $0x168] sm:$0xff] }
 0x12e   :  { %2189 = vmatpush3.bf16.xpose.msk.msra.mxu1 %vm2870_vm1, %v2187_v26  ;;  %2285 = vmatpush3.bf16.xpose.msk.msra.mxu0 %vm2870_vm1, %v2283_v29 }
 0x12f   :  { %v2223_v9 = vpack.c.bf16 %v3140_v11, %v3144_v18  ;;  %v2112_v26 = vpop.f32.mrb[40].mxu0  ;;  %2192 = vmatprep.subr.msk.bf16.mxu1 %vm2870_vm1, %v2190_v12  ;;  %2288 = vmatprep.subr.msk.bf16.mxu0 %vm2870_vm1, %v2286_v24  ;;  %v3580_v11 = vpack.c.bf16 %v3056_v52, %v3060_v22  ;;  %v3584_v22 = vpack.c.bf16 %v3118_v0, %v3122_v44 }
 0x130   :  { %v3184_v10 = vmul.f32 %v2112_v26, %v706_v45  ;;  %v3186_v17 = vmul.f32 %v2112_v26, %v770_v35  ;;  %v546_v29 = vpop.f32.mrb[41].mxu0  ;;  %v774_v45 = vld [vmem:[%s3570_s3 + $0x168] sm:$0xff]  ;;  %v709_v35 = vld [vmem:[%s3569_s2 + $0x160] sm:$0xff] }
 0x131   :  { %v3188_v25 = vmul.f32 %v705_v42, %v546_v29  ;;  %v3190_v5 = vmul.f32 %v769_v43, %v546_v29  ;;  %v773_v42 = vld [vmem:[%s3570_s3 + $0x160] sm:$0xff] }
 0x133   :  { %v2229_v12 = vpack.c.bf16 %v3184_v10, %v3188_v25  ;;  %v2115_v7 = vpop.f32.mrb[42].mxu0 }
 0x134   :  { %v3208_v21 = vmul.f32 %v2115_v7, %v708_v37  ;;  %v3210_v36 = vmul.f32 %v2115_v7, %v772_v40  ;;  %v556_v39 = vpop.f32.mrb[43].mxu0 }
 0x135   :  { %v3212_v47 = vmul.f32 %v707_v30, %v556_v39  ;;  %v3214_v58 = vmul.f32 %v771_v23, %v556_v39  ;;  %v714_v39 = vld [vmem:[%s3569_s2 + $0x188] sm:$0xff] }
 0x136   :  { %2195 = vmatpush3.bf16.xpose.msk.msra.mxu1 %vm2870_vm1, %v2193_v50  ;;  %2291 = vmatpush3.bf16.xpose.msk.msra.mxu0 %vm2870_vm1, %v2289_v53 }
 0x137   :  { %v2235_v31 = vpack.c.bf16 %v3208_v21, %v3212_v47  ;;  %v2118_v50 = vpop.f32.mrb[44].mxu0  ;;  %2198 = vmatprep.subr.msk.bf16.mxu1 %vm2870_vm1, %v2196_v48  ;;  %2294 = vmatprep.subr.msk.bf16.mxu0 %vm2870_vm1, %v2292_v51  ;;  %v3588_v0 = vpack.c.bf16 %v3210_v36, %v3214_v58 }
 0x138   :  { %v3252_v32 = vmul.f32 %v2118_v50, %v710_v13  ;;  %v3254_v41 = vmul.f32 %v2118_v50, %v774_v45  ;;  %v566_v53 = vpop.f32.mrb[45].mxu0  ;;  %v778_v13 = vld [vmem:[%s3570_s3 + $0x188] sm:$0xff]  ;;  %v3577_v45 = vpack.c.bf16 %v2832_v55, %v2836_v62  ;;  %v777_v50 = vld [vmem:[%s3570_s3 + $0x180] sm:$0xff] }
 0x139   :  { %v3256_v43 = vmul.f32 %v709_v35, %v566_v53  ;;  %v3258_v26 = vmul.f32 %v773_v42, %v566_v53  ;;  %v3578_v35 = vpack.c.bf16 %v2834_v56, %v2838_v1  ;;  %v713_v42 = vld [vmem:[%s3569_s2 + $0x180] sm:$0xff] }
 0x13b   :  { %v2241_v48 = vpack.c.bf16 %v3252_v32, %v3256_v43  ;;  %v2121_v29 = vpop.f32.mrb[46].mxu0  ;;  %v3589_v44 = vpack.c.bf16 %v3254_v41, %v3258_v26  ;;  %v2349_v43 = vmov 1983009808  }
 0x13c   :  { %v3276_v37 = vmul.f32 %v2121_v29, %v712_v27  ;;  %v3278_v40 = vmul.f32 %v2121_v29, %v776_v28  ;;  %v576_v30 = vpop.f32.mrb[47].mxu0  ;;  %v780_v29 = vld [vmem:[%s3570_s3 + $0x198] sm:$0xff]  ;;  %v1622_v26 = vunpack.c.l.s4 %v2349_v43 }
 0x13d   :  { %v3280_v23 = vmul.f32 %v711_v34, %v576_v30  ;;  %v3282_v7 = vmul.f32 %v775_v15, %v576_v30  ;;  %v716_v15 = vld [vmem:[%s3569_s2 + $0x198] sm:$0xff]  ;;  %v715_v30 = vld [vmem:[%s3569_s2 + $0x190] sm:$0xff] }
 0x13e   :  { %2201 = vmatpush3.bf16.xpose.msk.msra.mxu1 %vm2870_vm1, %v3577_v45  ;;  %2297 = vmatpush3.bf16.xpose.msk.msra.mxu0 %vm2870_vm1, %v3578_v35 }
 0x13f   :  { %v2247_v55 = vpack.c.bf16 %v3276_v37, %v3280_v23  ;;  %v2124_v53 = vpop.f32.mrb[48].mxu0  ;;  %v1623_v37 = vunpack.c.0.s8 %v1622_v26 }
 0x140   :  { %v842_v27 = vmul.f32 %v2124_v53, %v714_v39  ;;  %v3310_v56 = vmul.f32 %v2124_v53, %v778_v13  ;;  %v586_v1 = vpop.f32.mrb[49].mxu0  ;;  %v779_v39 = vld [vmem:[%s3570_s3 + $0x190] sm:$0xff] }
 0x141   :  { %v841_v28 = vmul.f32 %v713_v42, %v586_v1  ;;  %v3312_v34 = vmul.f32 %v777_v50, %v586_v1  ;;  %v3579_v1 = vmov 1.0  }
 0x143   :  { %v2202_v13 = vpack.c.bf16 %v842_v27, %v841_v28  ;;  %v2298_v45 = vpack.c.bf16 %v3310_v56, %v3312_v34  ;;  %v2127_v35 = vpop.f32.mrb[50].mxu0  ;;  %v718_v27 = vld [vmem:[%s3569_s2 + $0x1a8] sm:$0xff] }
 0x144   :  { %v844_v42 = vmul.f32 %v2127_v35, %v716_v15  ;;  %v3328_v50 = vmul.f32 %v2127_v35, %v780_v29  ;;  %v596_v53 = vpop.f32.mrb[51].mxu0  ;;  %v782_v28 = vld [vmem:[%s3570_s3 + $0x1a8] sm:$0xff]  ;;  %v717_v15 = vld [vmem:[%s3569_s2 + $0x1a0] sm:$0xff] }
 0x145   :  { %1939 = vmatmul.mubr.msk.f32.vlgmr.msra.gmra.mrb[0].mxu1 %vm87_vm0, %v3579_v1  ;;  %2204 = vmatprep.subr.msk.bf16.mxu1 %vm2870_vm1, %v2202_v13  ;;  %v843_v62 = vmul.f32 %v715_v30, %v596_v53  ;;  %v3334_v51 = vmul.f32 %v779_v39, %v596_v53  ;;  %v781_v29 = vld [vmem:[%s3570_s3 + $0x1a0] sm:$0xff]  ;;  %v726_v39 = vld [vmem:[%s3569_s2 + $0x1e8] sm:$0xff] }
 0x146   :  { %2007 = vmatmul.mubr.msk.f32.vlgmr.msra.gmra.mrb[64].mxu0 %vm87_vm0, %v3579_v1  ;;  %2207 = vmatpush3.bf16.xpose.msk.msra.mxu1 %vm2870_vm1, %v2205_v2 }
 0x147   :  { %v2208_v30 = vpack.c.bf16 %v844_v42, %v843_v62  ;;  %v2130_v13 = vpop.f32.mrb[52].mxu0  ;;  %1972 = vmatprep.mubr.msk.f32.mxu1 %vm87_vm0, %v3579_v1  ;;  %v720_v62 = vld [vmem:[%s3569_s2 + $0x1b8] sm:$0xff]  ;;  %v3581_v18 = vpack.c.bf16 %v3328_v50, %v3334_v51 }
 0x148   :  { %v846_v49 = vmul.f32 %v2130_v13, %v718_v27  ;;  %v3359_v16 = vmul.f32 %v2130_v13, %v782_v28  ;;  %v606_v2 = vpop.f32.mrb[53].mxu0  ;;  %v784_v42 = vld [vmem:[%s3570_s3 + $0x1b8] sm:$0xff]  ;;  %v719_v27 = vld [vmem:[%s3569_s2 + $0x1b0] sm:$0xff] }
 0x149   :  { %2210 = vmatprep.subr.msk.bf16.mxu1 %vm2870_vm1, %v2208_v30  ;;  %v845_v35 = vmul.f32 %v717_v15, %v606_v2  ;;  %v3363_v53 = vmul.f32 %v781_v29, %v606_v2  ;;  %v783_v28 = vld [vmem:[%s3570_s3 + $0x1b0] sm:$0xff]  ;;  %v788_v15 = vld [vmem:[%s3570_s3 + $0x1d8] sm:$0xff] }
 0x14b   :  { %v2214_v30 = vpack.c.bf16 %v846_v49, %v845_v35  ;;  %v2133_v29 = vpop.f32.mrb[54].mxu0  ;;  %v721_v49 = vld [vmem:[%s3569_s2 + $0x1c0] sm:$0xff]  ;;  %v3583_v52 = vpack.c.bf16 %v3359_v16, %v3363_v53 }
 0x14c   :  { %v848_v13 = vmul.f32 %v2133_v29, %v720_v62  ;;  %v3379_v2 = vmul.f32 %v2133_v29, %v784_v42  ;;  %v616_v38 = vpop.f32.mrb[55].mxu0  ;;  %v724_v29 = vld [vmem:[%s3569_s2 + $0x1d8] sm:$0xff] }
 0x14d   :  { %v847_v24 = vmul.f32 %v719_v27, %v616_v38  ;;  %v3381_v14 = vmul.f32 %v783_v28, %v616_v38  ;;  %v785_v38 = vld [vmem:[%s3570_s3 + $0x1c0] sm:$0xff] }
 0x14e   :  { %2213 = vmatpush3.bf16.xpose.msk.msra.mxu1 %vm2870_vm1, %v2211_v60 }
 0x14f   :  { %2216 = vmatprep.subr.msk.bf16.mxu1 %vm2870_vm1, %v2214_v30  ;;  %v2220_v35 = vpack.c.bf16 %v848_v13, %v847_v24  ;;  %v2136_v42 = vpop.f32.mrb[56].mxu0  ;;  %v723_v24 = vld [vmem:[%s3569_s2 + $0x1d0] sm:$0xff]  ;;  %v3585_v10 = vpack.c.bf16 %v3379_v2, %v3381_v14 }
 0x150   :  { %v850_v8 = vmul.f32 %v2136_v42, %v722_v57  ;;  %v3404_v46 = vmul.f32 %v2136_v42, %v786_v63  ;;  %v626_v60 = vpop.f32.mrb[57].mxu0  ;;  %v787_v63 = vld [vmem:[%s3570_s3 + $0x1d0] sm:$0xff] }
 0x151   :  { %v849_v27 = vmul.f32 %v721_v49, %v626_v60  ;;  %v1250_v28 = vmul.f32 %v785_v38, %v626_v60 }
 0x153   :  { %v2226_v57 = vpack.c.bf16 %v850_v8, %v849_v27  ;;  %v2322_v30 = vpack.c.bf16 %v3404_v46, %v1250_v28  ;;  %v2139_v13 = vpop.f32.mrb[58].mxu0  ;;  %v789_v8 = vld [vmem:[%s3570_s3 + $0x1e0] sm:$0xff] }
 0x154   :  { %v852_v49 = vmul.f32 %v2139_v13, %v724_v29  ;;  %v1253_v38 = vmul.f32 %v2139_v13, %v788_v15  ;;  %v636_v42 = vpop.f32.mrb[59].mxu0  ;;  %v725_v15 = vld [vmem:[%s3569_s2 + $0x1e0] sm:$0xff]  ;;  %v792_v13 = vld [vmem:[%s3570_s3 + $0x1f8] sm:$0xff] }
 0x155   :  { %v851_v60 = vmul.f32 %v723_v24, %v636_v42  ;;  %v1252_v62 = vmul.f32 %v787_v63, %v636_v42 }
 0x156   :  { %2219 = vmatpush3.bf16.xpose.msk.msra.mxu1 %vm2870_vm1, %v2217_v6  ;;  %v728_v6 = vld [vmem:[%s3569_s2 + $0x1f8] sm:$0xff] }
 0x157   :  { %2222 = vmatprep.subr.msk.bf16.mxu1 %vm2870_vm1, %v2220_v35  ;;  %v2232_v46 = vpack.c.bf16 %v852_v49, %v851_v60  ;;  %v2328_v27 = vpack.c.bf16 %v1253_v38, %v1252_v62  ;;  %v2142_v28 = vpop.f32.mrb[60].mxu0  ;;  %v727_v35 = vld [vmem:[%s3569_s2 + $0x1f0] sm:$0xff] }
 0x158   :  { %v854_v29 = vmul.f32 %v2142_v28, %v726_v39  ;;  %v1255_v24 = vmul.f32 %v2142_v28, %v790_v3  ;;  %v646_v61 = vpop.f32.mrb[61].mxu0  ;;  %v791_v39 = vld [vmem:[%s3570_s3 + $0x1f0] sm:$0xff] }
 0x159   :  { %v853_v33 = vmul.f32 %v725_v15, %v646_v61  ;;  %v1254_v63 = vmul.f32 %v789_v8, %v646_v61 }
 0x15b   :  { %v2238_v3 = vpack.c.bf16 %v854_v29, %v853_v33  ;;  %v2334_v62 = vpack.c.bf16 %v1255_v24, %v1254_v63  ;;  %v2145_v49 = vpop.f32.mrb[62].mxu0 }
 0x15c   :  { %v856_v38 = vmul.f32 %v2145_v49, %v728_v6  ;;  %v1257_v42 = vmul.f32 %v2145_v49, %v792_v13  ;;  %v656_v60 = vpop.f32.mrb[63].mxu0 }
 0x15d   :  { %v855_v15 = vmul.f32 %v727_v35, %v656_v60  ;;  %v1256_v8 = vmul.f32 %v791_v39, %v656_v60 }
 0x15e   :  { %2225 = vmatpush3.bf16.xpose.msk.msra.mxu1 %vm2870_vm1, %v2223_v9  ;;  %v3582_v9 = vpack.c.bf16 %v3080_v19, %v3084_v20  ;;  %v3586_v19 = vpack.c.bf16 %v3142_v54, %v3146_v4  ;;  %v3587_v20 = vpack.c.bf16 %v3186_v17, %v3190_v5  ;;  %v3590_v54 = vpack.c.bf16 %v3278_v40, %v3282_v7 }
 0x15f   :  { %2228 = vmatprep.subr.msk.bf16.mxu1 %vm2870_vm1, %v2226_v57  ;;  %v2244_v28 = vpack.c.bf16 %v856_v38, %v855_v15  ;;  %v2340_v61 = vpack.c.bf16 %v1257_v42, %v1256_v8  ;;  %v1610_v5 = vstv %s3571_s0 }
 0x166   :  { %2231 = vmatpush3.bf16.xpose.msk.msra.mxu1 %vm2870_vm1, %v2229_v12 }
 0x167   :  { %2234 = vmatprep.subr.msk.bf16.mxu1 %vm2870_vm1, %v2232_v46 }
 0x16e   :  { %2237 = vmatpush3.bf16.xpose.msk.msra.mxu1 %vm2870_vm1, %v2235_v31 }
 0x16f   :  { %2240 = vmatprep.subr.msk.bf16.mxu1 %vm2870_vm1, %v2238_v3 }
 0x176   :  { %2243 = vmatpush3.bf16.xpose.msk.msra.mxu1 %vm2870_vm1, %v2241_v48  ;;  %v1624_v48 = vlaneseq }
 0x177   :  { %2246 = vmatprep.subr.msk.bf16.mxu1 %vm2870_vm1, %v2244_v28 }
 0x178   :  { %v1625_v40 = vshrl.u32 %v1624_v48, 7 }
 0x17a   :  { %v1626_v50 = vsub.s32 %v1623_v37, %v1625_v40 }
 0x17e   :  { %2249 = vmatpush3.bf16.xpose.msk.msra.mxu1 %vm2870_vm1, %v2247_v55 }
 0x17f   :  { %2300 = vmatprep.subr.msk.bf16.mxu1 %vm2870_vm1, %v2298_v45 }
 0x185   :  { %1973 = vmatmul.mubr.msk.f32.vlgmr.msra.gmra.mrb[2].mxu1 %vm87_vm0, %v3579_v1 }
 0x186   :  { %2303 = vmatpush3.bf16.xpose.msk.msra.mxu1 %vm2870_vm1, %v3580_v11  ;;  %2040 = vmatprep.mubr.msk.f32.mxu1 %vm87_vm0, %v3579_v1 }
 0x187   :  { %2306 = vmatprep.subr.msk.bf16.mxu1 %vm2870_vm1, %v3581_v18 }
 0x18e   :  { %2309 = vmatpush3.bf16.xpose.msk.msra.mxu1 %vm2870_vm1, %v3582_v9 }
 0x18f   :  { %2312 = vmatprep.subr.msk.bf16.mxu1 %vm2870_vm1, %v3583_v52 }
 0x196   :  { %2315 = vmatpush3.bf16.xpose.msk.msra.mxu1 %vm2870_vm1, %v3584_v22 }
 0x197   :  { %2318 = vmatprep.subr.msk.bf16.mxu1 %vm2870_vm1, %v3585_v10 }
 0x19e   :  { %2321 = vmatpush3.bf16.xpose.msk.msra.mxu1 %vm2870_vm1, %v3586_v19 }
 0x19f   :  { %2324 = vmatprep.subr.msk.bf16.mxu1 %vm2870_vm1, %v2322_v30 }
 0x1a6   :  { %2327 = vmatpush3.bf16.xpose.msk.msra.mxu1 %vm2870_vm1, %v3587_v20 }
 0x1a7   :  { %2330 = vmatprep.subr.msk.bf16.mxu1 %vm2870_vm1, %v2328_v27 }
 0x1ae   :  { %2333 = vmatpush3.bf16.xpose.msk.msra.mxu1 %vm2870_vm1, %v3588_v0 }
 0x1af   :  { %2336 = vmatprep.subr.msk.bf16.mxu1 %vm2870_vm1, %v2334_v62 }
 0x1b6   :  { %2339 = vmatpush3.bf16.xpose.msk.msra.mxu1 %vm2870_vm1, %v3589_v44 }
 0x1b7   :  { %2342 = vmatprep.subr.msk.bf16.mxu1 %vm2870_vm1, %v2340_v61 }
 0x1be   :  { %2345 = vmatpush3.bf16.xpose.msk.msra.mxu1 %vm2870_vm1, %v3590_v54 }
 0x1c5   :  { %2041 = vmatmul.mubr.msk.f32.vlgmr.msra.gmra.mrb[4].mxu1 %vm87_vm0, %v3579_v1 }
 0x218   :  { %v1118_v4 = vpop.f32.mrb[0].mxu1 }
 0x219   :  { %v1516_v14 = vpop.f32.mrb[64].mxu0  ;;  %v1120_v17 = vpop.f32.mrb[1].mxu1 }
 0x21a   :  { %v1597_v25 = vrot.slane %v1516_v14, 7  ;;  %v1518_v12 = vpop.f32.mrb[65].mxu0 }
 0x21b   :  { %v1598_v21 = vrot.slane %v1518_v12, 7 }
 0x21c   :  { %v1606_v36 = vsel %vm1605_vm2, %v1118_v4, %v1597_v25 }
 0x21d   :  { %v1611_v47 = vadd.f32 %v1610_v5, %v1606_v36  ;;  %v1607_v59 = vsel %vm1605_vm2, %v1120_v17, %v1598_v21 }
 0x21e   :  { %v1612_v58 = vadd.f32 %v1610_v5, %v1607_v59 }
 0x220   :  { %v1619_v31 = vcombine.low %v1611_v47, %v1612_v58 }
 0x222   :  { %v1627_v53 = vrot.slane %v1619_v31, %v1626_v50 }
 0x258   :  { %v1189_v32 = vpop.f32.mrb[2].mxu1 }
 0x259   :  { %v1191_v41 = vpop.f32.mrb[3].mxu1 }
 0x298   :  { %v1587_v51 = vpop.f32.mrb[4].mxu1 }
 0x299   :  { %v1599_v23 = vrot.slane %v1587_v51, 7  ;;  %v1589_v7 = vpop.f32.mrb[5].mxu1 }
 0x29a   :  { %v1600_v55 = vrot.slane %v1589_v7, 7 }
 0x29b   :  { %v1608_v56 = vsel %vm1605_vm2, %v1189_v32, %v1599_v23 }
 0x29c   :  { %v1613_v34 = vadd.f32 %v1610_v5, %v1608_v56  ;;  %v1609_v45 = vsel %vm1605_vm2, %v1191_v41, %v1600_v55 }
 0x29d   :  { %v1614_v1 = vadd.f32 %v1610_v5, %v1609_v45 }
 0x29f   :  { %v1620_v16 = vcombine.low %v1613_v34, %v1614_v1 }
 0x2a1   :  { %v1634_v2 = vrot.slane %v1620_v16, %v1626_v50 }
 0x2a3   :  { %v1635_v57 = vcombine.low %v1627_v53, %v1634_v2 }
 0x2a5   :  { %1637 = vst [vmem:[%s3572_s5] sm:$0xff] %v1635_v57 }

</bundles_post_ra>
